<compile_context>
chip_gen: v7x
topology: tpu7x:2x2x1
jax: 0.10.0
libtpu: 0.0.40
codegen_flags: <defaults>
</compile_context>

<pallas_src>
import jax
import jax.numpy as jnp
from jax.experimental import pallas as pl
from jax.experimental.pallas import tpu as pltpu


def _glu_kernel(x1_ref, x2_ref, o_ref):
    # x1_ref, x2_ref, o_ref: (Bt, C, HWt)
    x1 = x1_ref[...].astype(jnp.float32)
    x2 = x2_ref[...].astype(jnp.float32)
    sig = 1.0 / (1.0 + jnp.exp(-x2))          # sigmoid; exp uses the EUP slot
    o_ref[...] = (x1 * sig).astype(o_ref.dtype)


def _choose_tiles(B, C, HW, itemsize, budget_bytes=8 * 1024 * 1024):
    """Pick (batch_tile, hw_tile) so the double-buffered working set fits the budget."""

    def step_bytes(bt, hwt):
        # two input blocks + one output block, each double-buffered
        return 2 * 3 * bt * C * hwt * itemsize

    # HW tile: keep lane axis a multiple of 128 when possible; otherwise use full HW.
    hwt = HW
    if HW % 128 == 0:
        while step_bytes(1, hwt) > budget_bytes and hwt % 256 == 0:
            hwt //= 2

    # Batch tile: largest divisor of B that fits the budget (>=1 sample per step).
    bt = 1
    for cand in range(B, 0, -1):
        if B % cand == 0 and step_bytes(cand, hwt) <= budget_bytes:
            bt = cand
            break
    return bt, hwt


def glu(x):
    """x: (B, 2*C, H, W) NCHW.  Returns (B, C, H, W) = x[:, :C] * sigmoid(x[:, C:])."""
    B, C2, H, W = x.shape
    assert C2 % 2 == 0, "GLU requires an even number of channels on dim=1"
    C = C2 // 2
    HW = H * W

    # (B, 2C, H, W) -> (B, 2, C, HW): contiguous reshape, free.
    x_r = x.reshape(B, 2, C, HW)

    bt, hwt = _choose_tiles(B, C, HW, x.dtype.itemsize)
    grid = (B // bt, HW // hwt)

    out_flat = pl.pallas_call(
        _glu_kernel,
        out_shape=jax.ShapeDtypeStruct((B, C, HW), x.dtype),
        grid_spec=pltpu.PrefetchScalarGridSpec(
            num_scalar_prefetch=0,
            grid=grid,
            in_specs=[
                # first half of channels (chunk 0) -> x1
                pl.BlockSpec((bt, None, C, hwt), lambda b, h: (b, 0, 0, h)),
                # second half of channels (chunk 1) -> x2
                pl.BlockSpec((bt, None, C, hwt), lambda b, h: (b, 1, 0, h)),
            ],
            out_specs=pl.BlockSpec((bt, C, hwt), lambda b, h: (b, 0, h)),
        ),
        compiler_params=pltpu.CompilerParams(
            dimension_semantics=("parallel", "parallel"),
        ),
    )(x_r, x_r)

    return out_flat.reshape(B, C, H, W)


def glu_reference(x):
    """Pure-JAX reference mirroring the PyTorch forward."""
    C = x.shape[1] // 2
    x1 = x[:, :C]
    x2 = x[:, C:]
    return x1 * jax.nn.sigmoid(x2)


if __name__ == "__main__":
    B, C_total, H, W = 2, 4, 16, 16   # channels=4 -> chunks of 2

    key = jax.random.PRNGKey(0)
    x = jax.random.normal(key, (B, C_total, H, W), dtype=jnp.float32)

    out = glu(x)
    jax.block_until_ready(out)

    ref = glu_reference(x)
    assert out.shape == ref.shape
    assert jnp.allclose(out, ref, atol=1e-5, rtol=1e-5), "Pallas GLU mismatch vs reference"

    print("KERNEL_OK")
</pallas_src>

<mosaic_0001>
module attributes {stable_mosaic.version = 11 : i64} {
  func.func @_glu_kernel(%arg0: i32, %arg1: i32, %arg2: memref<2x1x2x256xf32, #tpu.memory_space<vmem>>, %arg3: memref<2x1x2x256xf32, #tpu.memory_space<vmem>>, %arg4: memref<2x2x256xf32, #tpu.memory_space<vmem>>) attributes {dimension_semantics = [#tpu.dimension_semantics<parallel>, #tpu.dimension_semantics<parallel>], iteration_bounds = array<i64: 1, 1>, scalar_prefetch = 0 : i64, scratch_operands = 0 : i64, tpu.core_type = #tpu.core_type<tc>, window_params = [{transform_indices = @transform_0, window_bounds = array<i64: 2, 1, 2, 256>}, {transform_indices = @transform_1, window_bounds = array<i64: 2, 1, 2, 256>}, {transform_indices = @transform_2, window_bounds = array<i64: 2, 2, 256>}]} {
    %c0 = arith.constant 0 : index
    %c0_0 = arith.constant 0 : index
    %c0_1 = arith.constant 0 : index
    %c0_2 = arith.constant 0 : index
    %0 = vector.load %arg2[%c0, %c0_0, %c0_1, %c0_2] : memref<2x1x2x256xf32, #tpu.memory_space<vmem>>, vector<2x1x2x256xf32>
    %1 = vector.shape_cast %0 : vector<2x1x2x256xf32> to vector<2x2x256xf32>
    %c0_3 = arith.constant 0 : index
    %c0_4 = arith.constant 0 : index
    %c0_5 = arith.constant 0 : index
    %c0_6 = arith.constant 0 : index
    %2 = vector.load %arg3[%c0_3, %c0_4, %c0_5, %c0_6] : memref<2x1x2x256xf32, #tpu.memory_space<vmem>>, vector<2x1x2x256xf32>
    %3 = vector.shape_cast %2 : vector<2x1x2x256xf32> to vector<2x2x256xf32>
    %cst = arith.constant 0.000000e+00 : f32
    %4 = vector.broadcast %cst : f32 to vector<2x2x256xf32>
    %5 = arith.subf %4, %3 : vector<2x2x256xf32>
    %6 = math.exp %5 : vector<2x2x256xf32>
    %cst_7 = arith.constant 1.000000e+00 : f32
    %7 = vector.broadcast %cst_7 : f32 to vector<2x2x256xf32>
    %8 = arith.addf %7, %6 : vector<2x2x256xf32>
    %cst_8 = arith.constant 1.000000e+00 : f32
    %9 = vector.broadcast %cst_8 : f32 to vector<2x2x256xf32>
    %10 = arith.divf %9, %8 : vector<2x2x256xf32>
    %11 = arith.mulf %1, %10 : vector<2x2x256xf32>
    %c0_9 = arith.constant 0 : index
    %c0_10 = arith.constant 0 : index
    %c0_11 = arith.constant 0 : index
    %12 = vector.load %arg4[%c0_9, %c0_10, %c0_11] : memref<2x2x256xf32, #tpu.memory_space<vmem>>, vector<2x2x256xf32>
    tpu.vector_store %arg4[%c0_9, %c0_10, %c0_11], %11 {strides = array<i32>} : memref<2x2x256xf32, #tpu.memory_space<vmem>>, vector<2x2x256xf32>,
    return
  }
  func.func @transform_0(%arg0: i32, %arg1: i32) -> (i32, i32, i32, i32) {
    %c0_i32 = arith.constant 0 : i32
    %c0_i32_0 = arith.constant 0 : i32
    %c0_i32_1 = arith.constant 0 : i32
    return %arg0, %c0_i32, %c0_i32_0, %arg1 : i32, i32, i32, i32
  }
  func.func @transform_1(%arg0: i32, %arg1: i32) -> (i32, i32, i32, i32) {
    %c1_i32 = arith.constant 1 : i32
    %c0_i32 = arith.constant 0 : i32
    %c0_i32_0 = arith.constant 0 : i32
    return %arg0, %c1_i32, %c0_i32, %arg1 : i32, i32, i32, i32
  }
  func.func @transform_2(%arg0: i32, %arg1: i32) -> (i32, i32, i32) {
    %c0_i32 = arith.constant 0 : i32
    %c0_i32_0 = arith.constant 0 : i32
    return %arg0, %c0_i32, %arg1 : i32, i32, i32
  }
}

</mosaic_0001>

<bundles_post_ra>
// kernel: tpu_custom_call.1
= control target key start
LH: loop header
LB: loop body
LE: loop exit
PB: predicated region body
PF: predicated region fallthrough
CT: control target
= control target key end

     0   :  { %7 = vsyncpa [#allocation3], 0  ;;  %s235_s0 = inlined_call_operand.hbm [shape: f32[2,2,2,256], index: 0, kind: input, shape index: {}]   ;;  %s236_s1 = inlined_call_operand.hbm [shape: f32[2,2,2,256], index: 1, kind: input, shape index: {}]   ;;  %s237_s2 = inlined_call_operand.hbm [shape: f32[2,2,256], index: 2, kind: output, shape index: {}]  }
   0x1   :  { %8 = vsyncpa [#allocation6], 0 }
   0x2   :  { %9 = vsyncpa [#allocation4], 0  ;;  %s168_s9 = smov [#allocation2]   ;;  %s93_s13 = scalar_lea.hbm %s235_s0, 128 }
   0x3   :  { %s15_s10 = sshll.u32 %s168_s9, 4  ;;  %p94_p0 = scmp.ne.s32.totalorder %s235_s0, %s93_s13  ;;  %s16_s10 = int_to_ptr.vmem [resolvable:$true] %s15_s10 }
   0x4   :  { %s95_s18 = scalar_lea.hbm %s235_s0, 256  ;;  %p97_p2 = scmp.lt.u32.totalorder %s93_s13, %s235_s0 }
   0x5   :  { %p96_p1 = scmp.lt.u32.totalorder %s95_s18, %s93_s13 }
   0x7   :  { %p98_p3 = por %p97_p2, %p96_p1 }
   0x9   :  { %p99_p4 = pnand %p98_p3, %p94_p0 }
   0xb   :  { %102 = shalt.err (!%p99_p4)
}
   0xc   :  { %s103_s21 = scalar_lea.vmem %s16_s10, 128  ;;  %p108_p6 = scmp.lt.s32.totalorder %s16_s10, %s16_s10 }
   0xd   :  { %p104_p5 = scmp.ne.s32.totalorder %s16_s10, %s103_s21  ;;  %p109_p7 = scmp.lt.s32.totalorder %s103_s21, %s103_s21 }
   0xf   :  { %p110_p8 = por %p109_p7, %p108_p6 }
  0x11   :  { %p111_p9 = pnand %p110_p8, %p104_p5 }
  0x13   :  { %114 = shalt.err (!%p111_p9)
}
  0x14   :  { %s169_s22 = smov 128   ;;  %s170_s23 = smov 64  }
  0x15   :  { %s171_s24 = smov 4   ;;  %s27_s29 = scalar_lea.hbm %s236_s1, 64 }
  0x16   :  { %21 = dma.hbm_to_vmem [thread:$0]  %s235_s0, 128, %s16_s10, [#allocation3], %s169_s22, %s170_s23, %s171_s24  }
  0x17   :  { %s172_s30 = smov [#allocation5]   ;;  %s139_s6 = scalar_lea.hbm %s236_s1, 192 }
  0x18   :  { %s28_s3 = sshll.u32 %s172_s30, 4  ;;  %p116_p10 = scmp.ne.s32.totalorder %s27_s29, %s139_s6  ;;  %s29_s3 = int_to_ptr.vmem [resolvable:$true] %s28_s3 }
  0x19   :  { %s117_s9 = scalar_lea.hbm %s236_s1, 256  ;;  %p118_p11 = scmp.lt.u32.totalorder %s27_s29, %s236_s1 }
  0x1a   :  { %p119_p12 = scmp.lt.u32.totalorder %s117_s9, %s139_s6  ;;  %p121_p0 = scmp.lt.u32.totalorder %s139_s6, %s27_s29 }
  0x1c   :  { %p120_p13 = por %p119_p12, %p118_p11 }
  0x1e   :  { %p122_p1 = por %p121_p0, %p120_p13 }
  0x20   :  { %p123_p2 = pnand %p122_p1, %p116_p10 }
  0x22   :  { %126 = shalt.err (!%p123_p2)
}
  0x23   :  { %s127_s0 = scalar_lea.vmem %s29_s3, 128  ;;  %p132_p4 = scmp.lt.s32.totalorder %s29_s3, %s29_s3 }
  0x24   :  { %p128_p3 = scmp.ne.s32.totalorder %s29_s3, %s127_s0  ;;  %p133_p5 = scmp.lt.s32.totalorder %s127_s0, %s127_s0 }
  0x26   :  { %p134_p6 = por %p133_p5, %p132_p4 }
  0x28   :  { %p135_p7 = pnand %p134_p6, %p128_p3 }
  0x2a   :  { %138 = shalt.err (!%p135_p7)
}
  0x2b   :  { %34 = dma.hbm_to_vmem [thread:$0]  %s27_s29, 128, %s29_s3, [#allocation6], %s169_s22, %s170_s23, %s171_s24  }
  0x2c   :  { %162 = dma.done.wait [#allocation3], 128  }
  0x2d   :  { %163 = vsyncadd [#allocation3], 4294967168 }
  0x2e   :  { %164 = dma.done.wait [#allocation6], 128  }
  0x2f   :  { %165 = vsyncadd [#allocation6], 4294967168  ;;  %v43_v0 = vld [vmem:[#allocation5] sm:$0xf]  ;;  %v44_v2 = vld [vmem:[#allocation5 + $0x4] sm:$0xf] }
  0x30   :  { %v45_v1 = vsub.f32 0.0, %v43_v0  ;;  %v46_v3 = vsub.f32 0.0, %v44_v2  ;;  %v41_v10 = vld [vmem:[#allocation2] sm:$0xf]  ;;  %v42_v11 = vld [vmem:[#allocation2 + $0x4] sm:$0xf] }
  0x31   :  { %s173_s1 = smov [#allocation7]  }
  0x32   :  { %v47_v4 = vmul.f32 1.442695, %v45_v1  ;;  %v49_v5 = vmul.f32 1.442695, %v46_v3  ;;  %s66_s10 = sshll.u32 %s173_s1, 4  ;;  %s67_s10 = int_to_ptr.vmem [resolvable:$true] %s66_s10 }
  0x33   :  { %s140_s13 = scalar_lea.vmem %s67_s10, 128  ;;  %p145_p9 = scmp.lt.s32.totalorder %s67_s10, %s67_s10 }
  0x34   :  { %85 = vpow2.f32 %v47_v4  ;;  %p141_p8 = scmp.ne.s32.totalorder %s67_s10, %s140_s13  ;;  %p146_p10 = scmp.lt.s32.totalorder %s140_s13, %s140_s13 }
  0x35   :  { %87 = vpow2.f32 %v49_v5 }
  0x36   :  { %p147_p11 = por %p146_p10, %p145_p9 }
  0x38   :  { %p148_p12 = pnand %p147_p11, %p141_p8 }
  0x3e   :  { %v86_v6 = vpop.eup %85 }
  0x3f   :  { %v88_v7 = vpop.eup %87  ;;  %v51_v8 = vadd.f32 1.0, %v86_v6 }
  0x40   :  { %v52_v9 = vadd.f32 1.0, %v88_v7 }
  0x41   :  { %89 = vrcp.f32 %v51_v8 }
  0x42   :  { %91 = vrcp.f32 %v52_v9 }
  0x4b   :  { %v90_v12 = vpop.eup %89 }
  0x4c   :  { %v92_v13 = vpop.eup %91  ;;  %v57_v14 = vmul.f32 %v90_v12, %v41_v10 }
  0x4d   :  { %v58_v15 = vmul.f32 %v92_v13, %v42_v11 }
  0x4e   :  { %59 = vst [vmem:[#allocation7] sm:$0xf] %v57_v14 }
  0x4f   :  { %60 = vst [vmem:[#allocation7 + $0x4] sm:$0xf] %v58_v15 }
  0x50   :  { %151 = shalt.err (!%p148_p12)
}
  0x51   :  { %s152_s16 = scalar_lea.hbm %s237_s2, 128 }
  0x52   :  { %p153_p13 = scmp.ne.s32.totalorder %s237_s2, %s152_s16  ;;  %p156_p0 = scmp.lt.u32.totalorder %s152_s16, %s237_s2 }
  0x54   :  { %p158_p1 = pnand %p156_p0, %p153_p13 }
  0x56   :  { %161 = shalt.err (!%p158_p1)
}
  0x57   :  { %72 = dma.vmem_to_hbm [thread:$0]  %s67_s10, 128, %s237_s2, [#allocation4], %s170_s23, %s170_s23, %s171_s24  }
  0x58   :  { %166 = dma.done.wait [#allocation4], 128  }
  0x59   :  { %167 = vsyncadd [#allocation4], 4294967168 }
  0x5a   :  { %76 = vsyncpa [#allocation3], 1 }
  0x5b   :  { %77 = vsyncpa [#allocation6], 1 }
  0x5c   :  { %78 = vsyncpa [#allocation4], 1 }

</bundles_post_ra>
